<compile_context>
chip_gen: v6e
topology: v6e:2x2x1
jax: 0.10.0
libtpu: 0.0.40
codegen_flags: <defaults>
</compile_context>

<pallas_src>
import functools

import jax
import jax.numpy as jnp
from jax.experimental import pallas as pl
from jax.experimental.pallas import tpu as pltpu

BN_EPS = 1e-5
_LANE = 128
_SUBLANE = 8
_VMEM_LIMIT = 32 * 1024 * 1024  # safe on v5e / v6e / v7x


def _round_up(x, m):
    return ((x + m - 1) // m) * m


def _full_spec(a):
    # whole array resident in VMEM, same block for every grid step
    return pl.BlockSpec(a.shape, lambda *_: (0,) * a.ndim)


# --------------------------------------------------------------------------
# Fused single-tile kernel: fc1 + relu + BN (two-pass stats) + fc2/fc3/fc4
# --------------------------------------------------------------------------
def _fused_kernel(x_ref, w1_ref, b1_ref, g_ref, beta_ref,
                  w2_ref, b2_ref, w3_ref, b3_ref, w4_ref, b4_ref,
                  o_ref, *, actor, batch, rows, compute_dtype):
    h = jnp.dot(x_ref[...], w1_ref[...],
                preferred_element_type=jnp.float32) + b1_ref[...]
    h = jnp.maximum(h, 0.0)

    # mask rows that are batch padding so they do not pollute the statistics
    row = jax.lax.broadcasted_iota(jnp.int32, (rows, 1), 0)
    valid = row < batch
    inv_b = 1.0 / float(batch)

    hm = jnp.where(valid, h, 0.0)
    mean = jnp.sum(hm, axis=0, keepdims=True) * inv_b
    centered = jnp.where(valid, h - mean, 0.0)
    var = jnp.sum(centered * centered, axis=0, keepdims=True) * inv_b

    scale = g_ref[...] * jax.lax.rsqrt(var + BN_EPS)
    shift = beta_ref[...] - mean * scale
    h = h * scale + shift

    h = jnp.maximum(jnp.dot(h.astype(compute_dtype), w2_ref[...],
                            preferred_element_type=jnp.float32) + b2_ref[...], 0.0)
    h = jnp.maximum(jnp.dot(h.astype(compute_dtype), w3_ref[...],
                            preferred_element_type=jnp.float32) + b3_ref[...], 0.0)
    out = jnp.dot(h.astype(compute_dtype), w4_ref[...],
                  preferred_element_type=jnp.float32) + b4_ref[...]
    if actor:
        out = jnp.tanh(out)
    o_ref[...] = out.astype(o_ref.dtype)


# --------------------------------------------------------------------------
# Multi-tile phase 1: fc1 + relu, accumulate sum / sumsq across batch tiles,
# emit pre-folded BN scale / shift on the last grid step.
# --------------------------------------------------------------------------
def _bn_stats_kernel(x_ref, w1_ref, b1_ref, g_ref, beta_ref,
                     scale_ref, shift_ref, sum_sc, sq_sc, *,
                     block_rows, batch):
    i = pl.program_id(0)

    @pl.when(i == 0)
    def _():
        sum_sc[...] = jnp.zeros_like(sum_sc)
        sq_sc[...] = jnp.zeros_like(sq_sc)

    h = jnp.dot(x_ref[...], w1_ref[...],
                preferred_element_type=jnp.float32) + b1_ref[...]
    h = jnp.maximum(h, 0.0)

    row = i * block_rows + jax.lax.broadcasted_iota(jnp.int32, (block_rows, 1), 0)
    hm = jnp.where(row < batch, h, 0.0)
    sum_sc[...] += jnp.sum(hm, axis=0, keepdims=True)
    sq_sc[...] += jnp.sum(hm * hm, axis=0, keepdims=True)

    @pl.when(i == pl.num_programs(0) - 1)
    def _():
        inv_b = 1.0 / float(batch)
        mean = sum_sc[...] * inv_b
        var = jnp.maximum(sq_sc[...] * inv_b - mean * mean, 0.0)
        scale = g_ref[...] * jax.lax.rsqrt(var + BN_EPS)
        scale_ref[...] = scale
        shift_ref[...] = beta_ref[...] - mean * scale


# --------------------------------------------------------------------------
# Multi-tile phase 2: fc1 + relu (recomputed), folded BN, fc2/fc3/fc4 (+tanh)
# --------------------------------------------------------------------------
def _mlp_kernel(x_ref, scale_ref, shift_ref,
                w1_ref, b1_ref, w2_ref, b2_ref, w3_ref, b3_ref, w4_ref, b4_ref,
                o_ref, *, actor, compute_dtype):
    h = jnp.dot(x_ref[...], w1_ref[...],
                preferred_element_type=jnp.float32) + b1_ref[...]
    h = jnp.maximum(h, 0.0)

    # BatchNorm1d (training mode), pre-folded: h * scale + shift
    h = h * scale_ref[...] + shift_ref[...]

    h = jnp.maximum(jnp.dot(h.astype(compute_dtype), w2_ref[...],
                            preferred_element_type=jnp.float32) + b2_ref[...], 0.0)
    h = jnp.maximum(jnp.dot(h.astype(compute_dtype), w3_ref[...],
                            preferred_element_type=jnp.float32) + b3_ref[...], 0.0)
    out = jnp.dot(h.astype(compute_dtype), w4_ref[...],
                  preferred_element_type=jnp.float32) + b4_ref[...]
    if actor:
        out = jnp.tanh(out)
    o_ref[...] = out.astype(o_ref.dtype)


# --------------------------------------------------------------------------
# One-time parameter preparation: pad to lane-dense 128 multiples, cast
# matmul operands to bf16 (or keep f32 for exact validation).  Do this ONCE
# and reuse across forward calls.
# --------------------------------------------------------------------------
def prepare_params(params, *, use_bf16: bool = True):
    input_dim, h1 = params["w1"].shape
    h2 = params["w2"].shape[1]
    h3 = params["w3"].shape[1]
    out_dim = params["w4"].shape[1]
    in_p = _round_up(input_dim, _LANE)
    h1p, h2p, h3p, odp = (_round_up(d, _LANE) for d in (h1, h2, h3, out_dim))
    compute_dtype = jnp.bfloat16 if use_bf16 else jnp.float32

    def pad2(a, r, c, fill=0.0):
        return jnp.pad(a, ((0, r - a.shape[0]), (0, c - a.shape[1])),
                       constant_values=fill)

    return {
        "_prepared": True,
        "compute_dtype": compute_dtype,
        "input_dim": input_dim, "in_p": in_p,
        "h1p": h1p, "h2p": h2p, "h3p": h3p,
        "out_dim": out_dim, "odp": odp,
        # zero padding preserves exact semantics of the matmuls
        "w1": pad2(params["w1"], in_p, h1p).astype(compute_dtype),
        "w2": pad2(params["w2"], h1p, h2p).astype(compute_dtype),
        "w3": pad2(params["w3"], h2p, h3p).astype(compute_dtype),
        "w4": pad2(params["w4"], h3p, odp).astype(compute_dtype),
        "b1": pad2(params["b1"], 1, h1p),
        "b2": pad2(params["b2"], 1, h2p),
        "b3": pad2(params["b3"], 1, h3p),
        "b4": pad2(params["b4"], 1, odp),
        "gamma": pad2(params["bn_gamma"], 1, h1p, fill=1.0),
        "beta": pad2(params["bn_beta"], 1, h1p),
    }


# --------------------------------------------------------------------------
# Wrapper
# --------------------------------------------------------------------------
def network_forward(x, params, *, actor: bool = False, use_bf16: bool = True,
                    block_rows: int | None = None):
    """x: (B, input_dim) float32 (or (input_dim,)).

    params: raw dict from init_params OR the output of prepare_params.
    """
    if "_prepared" not in params:
        params = prepare_params(params, use_bf16=use_bf16)
    p = params
    compute_dtype = p["compute_dtype"]

    if x.ndim == 1:
        # mirrors torch.unsqueeze(x, 0) in the actor branch
        x = x[None, :]
    x = x.astype(jnp.float32)
    B, input_dim = x.shape
    assert input_dim == p["input_dim"]
    in_p, h1p, odp, out_dim = p["in_p"], p["h1p"], p["odp"], p["out_dim"]

    # batch tiling: multiple of 8 sublanes, capped at 1024 rows (per-tile
    # VMEM stays at ~1 MiB, so fatter tiles amortize per-step overhead)
    if block_rows is None:
        block_rows = 1024
    block_rows = min(block_rows, _round_up(B, _SUBLANE))
    block_rows = max(_SUBLANE, _round_up(block_rows, _SUBLANE))
    Bp = _round_up(B, block_rows)
    num_tiles = Bp // block_rows

    # pad batch + input_dim (lane-dense), pre-cast to the MXU dtype ONCE here
    xp = jnp.pad(x, ((0, Bp - B), (0, in_p - input_dim))).astype(compute_dtype)

    w_args = (p["w1"], p["b1"], p["gamma"], p["beta"],
              p["w2"], p["b2"], p["w3"], p["b3"], p["w4"], p["b4"])

    if num_tiles == 1:
        # ---- fused single-call path: stats from in-VMEM h1, no recompute ----
        out_pad = pl.pallas_call(
            functools.partial(_fused_kernel, actor=actor, batch=B, rows=Bp,
                              compute_dtype=compute_dtype),
            out_shape=jax.ShapeDtypeStruct((Bp, odp), jnp.float32),
            compiler_params=pltpu.CompilerParams(
                vmem_limit_bytes=_VMEM_LIMIT),
        )(xp, *w_args)
        return out_pad[:B, :out_dim]

    # ---- multi-tile two-phase path ----
    x_spec = pl.BlockSpec((block_rows, in_p), lambda i: (i, 0))

    # phase 1: batch statistics -> pre-folded BN scale/shift (accumulator)
    scale, shift = pl.pallas_call(
        functools.partial(_bn_stats_kernel, block_rows=block_rows, batch=B),
        grid=(num_tiles,),
        in_specs=[x_spec, _full_spec(p["w1"]), _full_spec(p["b1"]),
                  _full_spec(p["gamma"]), _full_spec(p["beta"])],
        out_specs=(pl.BlockSpec((1, h1p), lambda i: (0, 0)),
                   pl.BlockSpec((1, h1p), lambda i: (0, 0))),
        out_shape=(jax.ShapeDtypeStruct((1, h1p), jnp.float32),
                   jax.ShapeDtypeStruct((1, h1p), jnp.float32)),
        scratch_shapes=[pltpu.VMEM((1, h1p), jnp.float32),
                        pltpu.VMEM((1, h1p), jnp.float32)],
        compiler_params=pltpu.CompilerParams(
            dimension_semantics=("arbitrary",),
            vmem_limit_bytes=_VMEM_LIMIT),
    )(xp, p["w1"], p["b1"], p["gamma"], p["beta"])

    # phase 2: full MLP, batch axis fully parallel (megacore-shardable)
    out_pad = pl.pallas_call(
        functools.partial(_mlp_kernel, actor=actor,
                          compute_dtype=compute_dtype),
        grid=(num_tiles,),
        in_specs=[x_spec, _full_spec(scale), _full_spec(shift),
                  _full_spec(p["w1"]), _full_spec(p["b1"]),
                  _full_spec(p["w2"]), _full_spec(p["b2"]),
                  _full_spec(p["w3"]), _full_spec(p["b3"]),
                  _full_spec(p["w4"]), _full_spec(p["b4"])],
        out_specs=pl.BlockSpec((block_rows, odp), lambda i: (i, 0)),
        out_shape=jax.ShapeDtypeStruct((Bp, odp), jnp.float32),
        compiler_params=pltpu.CompilerParams(
            dimension_semantics=("parallel",),
            vmem_limit_bytes=_VMEM_LIMIT),
    )(xp, scale, shift, p["w1"], p["b1"], p["w2"], p["b2"],
      p["w3"], p["b3"], p["w4"], p["b4"])

    return out_pad[:B, :out_dim]


# --------------------------------------------------------------------------
# Parameter init (mimics PyTorch nn.Linear defaults; weights stored (in, out))
# --------------------------------------------------------------------------
def init_params(key, input_dim, h1, h2, h3, output_dim):
    keys = jax.random.split(key, 8)

    def linear(kw, kb, fan_in, fan_out):
        lim = 1.0 / jnp.sqrt(jnp.float32(fan_in))
        w = jax.random.uniform(kw, (fan_in, fan_out), jnp.float32, -lim, lim)
        b = jax.random.uniform(kb, (1, fan_out), jnp.float32, -lim, lim)
        return w, b

    w1, b1 = linear(keys[0], keys[1], input_dim, h1)
    w2, b2 = linear(keys[2], keys[3], h1, h2)
    w3, b3 = linear(keys[4], keys[5], h2, h3)
    w4, b4 = linear(keys[6], keys[7], h3, output_dim)
    return {
        "w1": w1, "b1": b1,
        "w2": w2, "b2": b2,
        "w3": w3, "b3": b3,
        "w4": w4, "b4": b4,
        "bn_gamma": jnp.ones((1, h1), jnp.float32),   # BatchNorm1d default weight
        "bn_beta": jnp.zeros((1, h1), jnp.float32),   # BatchNorm1d default bias
    }


def _reference_forward(x, params, *, actor: bool = False):
    """Pure-JAX reference with identical semantics."""
    if x.ndim == 1:
        x = x[None, :]
    h = jnp.maximum(x @ params["w1"] + params["b1"], 0.0)
    mean = jnp.mean(h, axis=0, keepdims=True)
    var = jnp.mean((h - mean) ** 2, axis=0, keepdims=True)
    h = (h - mean) / jnp.sqrt(var + BN_EPS) * params["bn_gamma"] + params["bn_beta"]
    h = jnp.maximum(h @ params["w2"] + params["b2"], 0.0)
    h = jnp.maximum(h @ params["w3"] + params["b3"], 0.0)
    out = h @ params["w4"] + params["b4"]
    return jnp.tanh(out) if actor else out


if __name__ == "__main__":
    key = jax.random.PRNGKey(0)
    k_param, k_x, k_x2 = jax.random.split(key, 3)

    batch, input_dim, h1, h2, h3, output_dim = 8, 32, 64, 64, 32, 4
    params = init_params(k_param, input_dim, h1, h2, h3, output_dim)
    x = jax.random.normal(k_x, (batch, input_dim), jnp.float32)

    ref_c = _reference_forward(x, params, actor=False)
    ref_a = _reference_forward(x, params, actor=True)

    # one-time padded/cast parameter prep (hoisted out of the hot path)
    prep_f32 = prepare_params(params, use_bf16=False)
    prep_bf16 = prepare_params(params, use_bf16=True)

    # exact-semantics check (f32 matmuls), fused single-call path
    out_c = network_forward(x, prep_f32, actor=False)
    out_a = network_forward(x, prep_f32, actor=True)
    jax.block_until_ready((out_c, out_a))
    assert out_c.shape == (batch, output_dim)
    assert out_a.shape == (batch, output_dim)
    assert jnp.allclose(out_c, ref_c, atol=1e-4, rtol=1e-4)
    assert jnp.allclose(out_a, ref_a, atol=1e-4, rtol=1e-4)

    # bf16 MXU path (f32 accumulation) — looser tolerance vs. f32 reference
    out_cb = network_forward(x, prep_bf16, actor=False)
    out_ab = network_forward(x, prep_bf16, actor=True)
    jax.block_until_ready((out_cb, out_ab))
    assert jnp.allclose(out_cb, ref_c, atol=5e-2, rtol=5e-2)
    assert jnp.allclose(out_ab, ref_a, atol=5e-2, rtol=5e-2)

    # raw (unprepared) params path still works
    out_raw = network_forward(x, params, actor=False, use_bf16=False)
    jax.block_until_ready(out_raw)
    assert jnp.allclose(out_raw, ref_c, atol=1e-4, rtol=1e-4)

    # multi-tile batch with padding/masking (exercises two-phase BN across tiles)
    xb = jax.random.normal(k_x2, (300, input_dim), jnp.float32)
    out_big = network_forward(xb, prep_f32, actor=True, block_rows=128)
    jax.block_until_ready(out_big)
    ref_big = _reference_forward(xb, params, actor=True)
    assert out_big.shape == (300, output_dim)
    assert jnp.allclose(out_big, ref_big, atol=1e-4, rtol=1e-4)

    # 1-D actor input (mirrors torch.unsqueeze; batch=1 train-mode BN)
    out1 = network_forward(x[0], prep_f32, actor=True)
    jax.block_until_ready(out1)
    assert out1.shape == (1, output_dim)

    print("KERNEL_OK")
</pallas_src>

<mosaic_0001>
module attributes {stable_mosaic.version = 11 : i64} {
  func.func @_fused_kernel(%arg0: memref<8x128xf32, #tpu.memory_space<vmem>>, %arg1: memref<128x128xf32, #tpu.memory_space<vmem>>, %arg2: memref<1x128xf32, #tpu.memory_space<vmem>>, %arg3: memref<1x128xf32, #tpu.memory_space<vmem>>, %arg4: memref<1x128xf32, #tpu.memory_space<vmem>>, %arg5: memref<128x128xf32, #tpu.memory_space<vmem>>, %arg6: memref<1x128xf32, #tpu.memory_space<vmem>>, %arg7: memref<128x128xf32, #tpu.memory_space<vmem>>, %arg8: memref<1x128xf32, #tpu.memory_space<vmem>>, %arg9: memref<128x128xf32, #tpu.memory_space<vmem>>, %arg10: memref<1x128xf32, #tpu.memory_space<vmem>>, %arg11: memref<8x128xf32, #tpu.memory_space<vmem>>) attributes {dimension_semantics = [], scalar_prefetch = 0 : i64, scratch_operands = 0 : i64, tpu.core_type = #tpu.core_type<tc>} {
    %c0 = arith.constant 0 : index
    %c0_0 = arith.constant 0 : index
    %0 = vector.load %arg0[%c0, %c0_0] : memref<8x128xf32, #tpu.memory_space<vmem>>, vector<8x128xf32>
    %c0_1 = arith.constant 0 : index
    %c0_2 = arith.constant 0 : index
    %1 = vector.load %arg1[%c0_1, %c0_2] : memref<128x128xf32, #tpu.memory_space<vmem>>, vector<128x128xf32>
    %cst = arith.constant dense<0.000000e+00> : vector<8x128xf32>
    %2 = tpu.matmul %0, %1, %cst {dimension_numbers = #tpu.dot_dimension_numbers<[1], [0], [0], [1], [0, 0, 1, 1], [], []>} : vector<8x128xf32>, vector<128x128xf32>, vector<8x128xf32> -> vector<8x128xf32>
    %c0_3 = arith.constant 0 : index
    %c0_4 = arith.constant 0 : index
    %3 = vector.load %arg2[%c0_3, %c0_4] : memref<1x128xf32, #tpu.memory_space<vmem>>, vector<1x128xf32>
    %4 = vector.broadcast %3 : vector<1x128xf32> to vector<8x128xf32>
    %5 = arith.addf %2, %4 : vector<8x128xf32>
    %cst_5 = arith.constant 0.000000e+00 : f32
    %6 = vector.broadcast %cst_5 : f32 to vector<8x128xf32>
    %7 = arith.maximumf %5, %6 : vector<8x128xf32>
    %8 = tpu.iota {dimensions = array<i32: 0>} : vector<8x1xi32>
    %c8_i32 = arith.constant 8 : i32
    %9 = vector.broadcast %c8_i32 : i32 to vector<8x1xi32>
    %10 = arith.cmpi slt, %8, %9 : vector<8x1xi32>
    %cst_6 = arith.constant 0.000000e+00 : f32
    %11 = vector.shape_cast %10 : vector<8x1xi1> to vector<8x1xi1>
    %12 = vector.broadcast %11 : vector<8x1xi1> to vector<8x128xi1>
    %13 = vector.broadcast %cst_6 : f32 to vector<8x128xf32>
    %14 = arith.select %12, %7, %13 : vector<8x128xi1>, vector<8x128xf32>
    %cst_7 = arith.constant dense<0.000000e+00> : vector<128xf32>
    %15 = vector.multi_reduction <add>, %14, %cst_7 [0] : vector<8x128xf32> to vector<128xf32>
    %16 = vector.shape_cast %15 : vector<128xf32> to vector<1x128xf32>
    %cst_8 = arith.constant 1.250000e-01 : f32
    %17 = vector.broadcast %cst_8 : f32 to vector<1x128xf32>
    %18 = arith.mulf %16, %17 : vector<1x128xf32>
    %19 = vector.broadcast %18 : vector<1x128xf32> to vector<8x128xf32>
    %20 = arith.subf %7, %19 : vector<8x128xf32>
    %cst_9 = arith.constant 0.000000e+00 : f32
    %21 = vector.shape_cast %10 : vector<8x1xi1> to vector<8x1xi1>
    %22 = vector.broadcast %21 : vector<8x1xi1> to vector<8x128xi1>
    %23 = vector.broadcast %cst_9 : f32 to vector<8x128xf32>
    %24 = arith.select %22, %20, %23 : vector<8x128xi1>, vector<8x128xf32>
    %25 = arith.mulf %24, %24 : vector<8x128xf32>
    %cst_10 = arith.constant dense<0.000000e+00> : vector<128xf32>
    %26 = vector.multi_reduction <add>, %25, %cst_10 [0] : vector<8x128xf32> to vector<128xf32>
    %27 = vector.shape_cast %26 : vector<128xf32> to vector<1x128xf32>
    %cst_11 = arith.constant 1.250000e-01 : f32
    %28 = vector.broadcast %cst_11 : f32 to vector<1x128xf32>
    %29 = arith.mulf %27, %28 : vector<1x128xf32>
    %c0_12 = arith.constant 0 : index
    %c0_13 = arith.constant 0 : index
    %30 = vector.load %arg3[%c0_12, %c0_13] : memref<1x128xf32, #tpu.memory_space<vmem>>, vector<1x128xf32>
    %cst_14 = arith.constant 9.99999974E-6 : f32
    %31 = vector.broadcast %cst_14 : f32 to vector<1x128xf32>
    %32 = arith.addf %29, %31 : vector<1x128xf32>
    %33 = math.rsqrt %32 : vector<1x128xf32>
    %34 = arith.mulf %30, %33 : vector<1x128xf32>
    %c0_15 = arith.constant 0 : index
    %c0_16 = arith.constant 0 : index
    %35 = vector.load %arg4[%c0_15, %c0_16] : memref<1x128xf32, #tpu.memory_space<vmem>>, vector<1x128xf32>
    %36 = arith.mulf %18, %34 : vector<1x128xf32>
    %37 = arith.subf %35, %36 : vector<1x128xf32>
    %38 = vector.broadcast %34 : vector<1x128xf32> to vector<8x128xf32>
    %39 = arith.mulf %7, %38 : vector<8x128xf32>
    %40 = vector.broadcast %37 : vector<1x128xf32> to vector<8x128xf32>
    %41 = arith.addf %39, %40 : vector<8x128xf32>
    %c0_17 = arith.constant 0 : index
    %c0_18 = arith.constant 0 : index
    %42 = vector.load %arg5[%c0_17, %c0_18] : memref<128x128xf32, #tpu.memory_space<vmem>>, vector<128x128xf32>
    %cst_19 = arith.constant dense<0.000000e+00> : vector<8x128xf32>
    %43 = tpu.matmul %41, %42, %cst_19 {dimension_numbers = #tpu.dot_dimension_numbers<[1], [0], [0], [1], [0, 0, 1, 1], [], []>} : vector<8x128xf32>, vector<128x128xf32>, vector<8x128xf32> -> vector<8x128xf32>
    %c0_20 = arith.constant 0 : index
    %c0_21 = arith.constant 0 : index
    %44 = vector.load %arg6[%c0_20, %c0_21] : memref<1x128xf32, #tpu.memory_space<vmem>>, vector<1x128xf32>
    %45 = vector.broadcast %44 : vector<1x128xf32> to vector<8x128xf32>
    %46 = arith.addf %43, %45 : vector<8x128xf32>
    %cst_22 = arith.constant 0.000000e+00 : f32
    %47 = vector.broadcast %cst_22 : f32 to vector<8x128xf32>
    %48 = arith.maximumf %46, %47 : vector<8x128xf32>
    %c0_23 = arith.constant 0 : index
    %c0_24 = arith.constant 0 : index
    %49 = vector.load %arg7[%c0_23, %c0_24] : memref<128x128xf32, #tpu.memory_space<vmem>>, vector<128x128xf32>
    %cst_25 = arith.constant dense<0.000000e+00> : vector<8x128xf32>
    %50 = tpu.matmul %48, %49, %cst_25 {dimension_numbers = #tpu.dot_dimension_numbers<[1], [0], [0], [1], [0, 0, 1, 1], [], []>} : vector<8x128xf32>, vector<128x128xf32>, vector<8x128xf32> -> vector<8x128xf32>
    %c0_26 = arith.constant 0 : index
    %c0_27 = arith.constant 0 : index
    %51 = vector.load %arg8[%c0_26, %c0_27] : memref<1x128xf32, #tpu.memory_space<vmem>>, vector<1x128xf32>
    %52 = vector.broadcast %51 : vector<1x128xf32> to vector<8x128xf32>
    %53 = arith.addf %50, %52 : vector<8x128xf32>
    %cst_28 = arith.constant 0.000000e+00 : f32
    %54 = vector.broadcast %cst_28 : f32 to vector<8x128xf32>
    %55 = arith.maximumf %53, %54 : vector<8x128xf32>
    %c0_29 = arith.constant 0 : index
    %c0_30 = arith.constant 0 : index
    %56 = vector.load %arg9[%c0_29, %c0_30] : memref<128x128xf32, #tpu.memory_space<vmem>>, vector<128x128xf32>
    %cst_31 = arith.constant dense<0.000000e+00> : vector<8x128xf32>
    %57 = tpu.matmul %55, %56, %cst_31 {dimension_numbers = #tpu.dot_dimension_numbers<[1], [0], [0], [1], [0, 0, 1, 1], [], []>} : vector<8x128xf32>, vector<128x128xf32>, vector<8x128xf32> -> vector<8x128xf32>
    %c0_32 = arith.constant 0 : index
    %c0_33 = arith.constant 0 : index
    %58 = vector.load %arg10[%c0_32, %c0_33] : memref<1x128xf32, #tpu.memory_space<vmem>>, vector<1x128xf32>
    %59 = vector.broadcast %58 : vector<1x128xf32> to vector<8x128xf32>
    %60 = arith.addf %57, %59 : vector<8x128xf32>
    %c0_34 = arith.constant 0 : index
    %c0_35 = arith.constant 0 : index
    %61 = vector.load %arg11[%c0_34, %c0_35] : memref<8x128xf32, #tpu.memory_space<vmem>>, vector<8x128xf32>
    tpu.vector_store %arg11[%c0_34, %c0_35], %60 {strides = array<i32>} : memref<8x128xf32, #tpu.memory_space<vmem>>, vector<8x128xf32>,
    return
  }
}

</mosaic_0001>

<bundles_post_ra>
// kernel: tpu_custom_call.1
= control target key start
LH: loop header
LB: loop body
LE: loop exit
PB: predicated region body
PF: predicated region fallthrough
CT: control target
= control target key end

     0   :  { %16 = vsyncpa [#allocation3], 0  ;;  %s1085_s0 = inlined_call_operand.hbm [shape: f32[8,128], index: 0, kind: input, shape index: {}]   ;;  %s1086_s1 = inlined_call_operand.hbm [shape: f32[128,128], index: 1, kind: input, shape index: {}]   ;;  %s1087_s2 = inlined_call_operand.vmem [shape: f32[1,128], index: 2, kind: input, shape index: {}]   ;;  %s1088_s3 = inlined_call_operand.vmem [shape: f32[1,128], index: 3, kind: input, shape index: {}]   ;;  %s1089_s4 = inlined_call_operand.vmem [shape: f32[1,128], index: 4, kind: input, shape index: {}]   ;;  %s1090_s5 = inlined_call_operand.hbm [shape: f32[128,128], index: 5, kind: input, shape index: {}]   ;;  %s1091_s6 = inlined_call_operand.vmem [shape: f32[1,128], index: 6, kind: input, shape index: {}]   ;;  %s1092_s7 = inlined_call_operand.hbm [shape: f32[128,128], index: 7, kind: input, shape index: {}]   ;;  %s1093_s8 = inlined_call_operand.vmem [shape: f32[1,128], index: 8, kind: input, shape index: {}]   ;;  %s1094_s9 = inlined_call_operand.hbm [shape: f32[128,128], index: 9, kind: input, shape index: {}]   ;;  %s1095_s10 = inlined_call_operand.vmem [shape: f32[1,128], index: 10, kind: input, shape index: {}]   ;;  %s1096_s11 = inlined_call_operand.hbm [shape: f32[8,128], index: 11, kind: output, shape index: {}]  }
   0x1   :  { %17 = vsyncpa [#allocation6], 0 }
   0x2   :  { %18 = vsyncpa [#allocation9], 0 }
   0x3   :  { %19 = vsyncpa [#allocation4], 0  ;;  %s895_s17 = smov [#allocation5]  }
   0x4   :  { %s35_s18 = sshll.u32 %s895_s17, 4  ;;  %s36_s18 = int_to_ptr.vmem [resolvable:$true] %s35_s18 }
   0x5   :  { %s775_s19 = scalar_lea.vmem %s36_s18, 2048  ;;  %p780_p1 = scmp.lt.s32.totalorder %s36_s18, %s36_s18 }
   0x6   :  { %p776_p0 = scmp.ne.s32.totalorder %s36_s18, %s775_s19  ;;  %p781_p2 = scmp.lt.s32.totalorder %s775_s19, %s775_s19 }
   0x8   :  { %p782_p3 = por %p781_p2, %p780_p1 }
   0xa   :  { %p783_p4 = pnand %p782_p3, %p776_p0 }
   0xc   :  { %786 = shalt.err (!%p783_p4)
}
   0xd   :  { %s896_s20 = smov 128   ;;  %s897_s21 = smov 8  }
   0xe   :  { %41 = dma.hbm_to_vmem [thread:$0]  %s1086_s1, 2048, %s36_s18, [#allocation6], %s896_s20, %s896_s20, %s897_s21  }
   0xf   :  { %s898_s24 = smov [#allocation8]   ;;  %s899_s26 = smov [#allocation2]  }
  0x10   :  { %s67_s25 = sshll.u32 %s898_s24, 4  ;;  %s26_s27 = sshll.u32 %s899_s26, 4  ;;  %s68_s25 = int_to_ptr.vmem [resolvable:$true] %s67_s25  ;;  %s27_s27 = int_to_ptr.vmem [resolvable:$true] %s26_s27 }
  0x11   :  { %s795_s28 = scalar_lea.vmem %s68_s25, 2048  ;;  %p800_p6 = scmp.lt.s32.totalorder %s68_s25, %s68_s25 }
  0x12   :  { %p796_p5 = scmp.ne.s32.totalorder %s68_s25, %s795_s28  ;;  %p801_p7 = scmp.lt.s32.totalorder %s795_s28, %s795_s28 }
  0x14   :  { %p802_p8 = por %p801_p7, %p800_p6 }
  0x16   :  { %p803_p9 = pnand %p802_p8, %p796_p5 }
  0x18   :  { %806 = shalt.err (!%p803_p9)
}
  0x19   :  { %73 = dma.hbm_to_vmem [thread:$0]  %s1092_s7, 2048, %s68_s25, [#allocation9], %s896_s20, %s896_s20, %s897_s21  }
  0x1a   :  { %s815_s1 = scalar_lea.vmem %s27_s27, 128  ;;  %p820_p11 = scmp.lt.s32.totalorder %s27_s27, %s27_s27 }
  0x1b   :  { %p816_p10 = scmp.ne.s32.totalorder %s27_s27, %s815_s1  ;;  %p821_p12 = scmp.lt.s32.totalorder %s815_s1, %s815_s1 }
  0x1d   :  { %p822_p13 = por %p821_p12, %p820_p11 }
  0x1f   :  { %p823_p0 = pnand %p822_p13, %p816_p10 }
  0x21   :  { %826 = shalt.err (!%p823_p0)
}
  0x22   :  { %29 = dma.hbm_to_vmem [thread:$0]  %s1085_s0, 128, %s27_s27, [#allocation3]  }
  0x23   :  { %s900_s14 = smov [#allocation7]   ;;  %s901_s16 = smov [#allocation10]  }
  0x24   :  { %s53_s15 = sshll.u32 %s900_s14, 4  ;;  %s81_s17 = sshll.u32 %s901_s16, 4  ;;  %s54_s15 = int_to_ptr.vmem [resolvable:$true] %s53_s15  ;;  %s82_s17 = int_to_ptr.vmem [resolvable:$true] %s81_s17 }
  0x25   :  { %s835_s18 = scalar_lea.vmem %s54_s15, 2048  ;;  %p840_p2 = scmp.lt.s32.totalorder %s54_s15, %s54_s15 }
  0x26   :  { %p836_p1 = scmp.ne.s32.totalorder %s54_s15, %s835_s18  ;;  %p841_p3 = scmp.lt.s32.totalorder %s835_s18, %s835_s18 }
  0x28   :  { %p842_p4 = por %p841_p3, %p840_p2 }
  0x2a   :  { %p843_p5 = pnand %p842_p4, %p836_p1 }
  0x2c   :  { %846 = shalt.err (!%p843_p5)
}
  0x2d   :  { %59 = dma.hbm_to_vmem [thread:$0]  %s1090_s5, 2048, %s54_s15, [#allocation6], %s896_s20, %s896_s20, %s897_s21  }
  0x2e   :  { %s855_s0 = scalar_lea.vmem %s82_s17, 2048  ;;  %p860_p7 = scmp.lt.s32.totalorder %s82_s17, %s82_s17 }
  0x2f   :  { %p856_p6 = scmp.ne.s32.totalorder %s82_s17, %s855_s0  ;;  %p861_p8 = scmp.lt.s32.totalorder %s855_s0, %s855_s0 }
  0x31   :  { %p862_p9 = por %p861_p8, %p860_p7 }
  0x33   :  { %p863_p10 = pnand %p862_p9, %p856_p6 }
  0x35   :  { %866 = shalt.err (!%p863_p10)
}
  0x36   :  { %87 = dma.hbm_to_vmem [thread:$0]  %s1094_s9, 2048, %s82_s17, [#allocation9], %s896_s20, %s896_s20, %s897_s21  }
  0x37   :  { %887 = dma.done.wait [#allocation3], 128  }
  0x38   :  { %888 = vsyncadd [#allocation3], 4294967168 }
  0x39   :  { %889 = dma.done.wait [#allocation6], 4096  }
  0x3a   :  { %890 = vsyncadd [#allocation6], 4294963200 }
  0x3b   :  { %891 = dma.done.wait [#allocation9], 4096  }
  0x3c   :  { %892 = vsyncadd [#allocation9], 4294963200  ;;  %v902_v0 = vmov 0.0   ;;  %vm903_vm0 = vmmov 0   ;;  %v121_v1 = vld [vmem:[#allocation5 + $0x78] sm:$0xff]  ;;  %v120_v2 = vld [vmem:[#allocation5 + $0x70] sm:$0xff] }
  0x3d   :  { %615 = vmatprep.subr.mxu0 %v902_v0  ;;  %647 = vmatprep.mubr.msk.f32.mxu0 %vm903_vm0, %v902_v0  ;;  %v119_v3 = vld [vmem:[#allocation5 + $0x68] sm:$0xff]  ;;  %v118_v4 = vld [vmem:[#allocation5 + $0x60] sm:$0xff]  ;;  %v117_v5 = vld [vmem:[#allocation5 + $0x58] sm:$0xff]  ;;  %s904_s28 = smov [#allocation11]  }
  0x3e   :  { %650 = vmatprep.subr.mxu1 %v902_v0  ;;  %682 = vmatprep.mubr.msk.f32.mxu1 %vm903_vm0, %v902_v0  ;;  %v116_v6 = vld [vmem:[#allocation5 + $0x50] sm:$0xff]  ;;  %v115_v7 = vld [vmem:[#allocation5 + $0x48] sm:$0xff]  ;;  %v114_v8 = vld [vmem:[#allocation5 + $0x40] sm:$0xff]  ;;  %s532_s29 = sshll.u32 %s904_s28, 4  ;;  %s533_s29 = int_to_ptr.vmem [resolvable:$true] %s532_s29 }
  0x3f   :  { %616 = vmatpush3.msra.mxu0 %v121_v1  ;;  %v113_v9 = vld [vmem:[#allocation5 + $0x38] sm:$0xff]  ;;  %v112_v10 = vld [vmem:[#allocation5 + $0x30] sm:$0xff]  ;;  %v111_v11 = vld [vmem:[#allocation5 + $0x28] sm:$0xff]  ;;  %s867_s30 = scalar_lea.vmem %s533_s29, 128  ;;  %p872_p12 = scmp.lt.s32.totalorder %s533_s29, %s533_s29 }
  0x40   :  { %617 = vmatprep.subr.mxu0 %v902_v0  ;;  %v110_v12 = vld [vmem:[#allocation5 + $0x20] sm:$0xff]  ;;  %v109_v13 = vld [vmem:[#allocation5 + $0x18] sm:$0xff]  ;;  %v108_v14 = vld [vmem:[#allocation5 + $0x10] sm:$0xff]  ;;  %p868_p11 = scmp.ne.s32.totalorder %s533_s29, %s867_s30  ;;  %p873_p13 = scmp.lt.s32.totalorder %s867_s30, %s867_s30 }
  0x41   :  { %618 = vmatpush3.msra.mxu0 %v120_v2  ;;  %v107_v15 = vld [vmem:[#allocation5 + $0x8] sm:$0xff]  ;;  %v106_v16 = vld [vmem:[#allocation5] sm:$0xff]  ;;  %v105_v17 = vld [vmem:[#allocation2] sm:$0xff] }
  0x42   :  { %619 = vmatprep.subr.mxu0 %v902_v0  ;;  %v259_v18 = vld [vmem:[#allocation7 + $0x78] sm:$0xff]  ;;  %v258_v19 = vld [vmem:[#allocation7 + $0x70] sm:$0xff]  ;;  %v257_v20 = vld [vmem:[#allocation7 + $0x68] sm:$0xff]  ;;  %p874_p0 = por %p873_p13, %p872_p12 }
  0x43   :  { %620 = vmatpush3.msra.mxu0 %v119_v3  ;;  %651 = vmatpush3.msra.mxu1 %v259_v18  ;;  %v256_v21 = vld [vmem:[#allocation7 + $0x60] sm:$0xff]  ;;  %v255_v22 = vld [vmem:[#allocation7 + $0x58] sm:$0xff]  ;;  %v254_v23 = vld [vmem:[#allocation7 + $0x50] sm:$0xff] }
  0x44   :  { %621 = vmatprep.subr.mxu0 %v902_v0  ;;  %652 = vmatprep.subr.mxu1 %v902_v0  ;;  %v253_v24 = vld [vmem:[#allocation7 + $0x48] sm:$0xff]  ;;  %v252_v25 = vld [vmem:[#allocation7 + $0x40] sm:$0xff]  ;;  %v251_v26 = vld [vmem:[#allocation7 + $0x38] sm:$0xff]  ;;  %p875_p1 = pnand %p874_p0, %p868_p11 }
  0x45   :  { %622 = vmatpush3.msra.mxu0 %v118_v4  ;;  %653 = vmatpush3.msra.mxu1 %v258_v19  ;;  %v250_v27 = vld [vmem:[#allocation7 + $0x30] sm:$0xff]  ;;  %v249_v28 = vld [vmem:[#allocation7 + $0x28] sm:$0xff]  ;;  %v248_v29 = vld [vmem:[#allocation7 + $0x20] sm:$0xff] }
  0x46   :  { %623 = vmatprep.subr.mxu0 %v902_v0  ;;  %654 = vmatprep.subr.mxu1 %v902_v0  ;;  %v247_v30 = vld [vmem:[#allocation7 + $0x18] sm:$0xff]  ;;  %v246_v31 = vld [vmem:[#allocation7 + $0x10] sm:$0xff]  ;;  %v245_v32 = vld [vmem:[#allocation7 + $0x8] sm:$0xff] }
  0x47   :  { %624 = vmatpush3.msra.mxu0 %v117_v5  ;;  %655 = vmatpush3.msra.mxu1 %v257_v20  ;;  %v244_v33 = vld [vmem:[#allocation7] sm:$0xff]  ;;  %v353_v34 = vld [vmem:[#allocation8 + $0x78] sm:$0xff]  ;;  %v352_v35 = vld [vmem:[#allocation8 + $0x70] sm:$0xff] }
  0x48   :  { %625 = vmatprep.subr.mxu0 %v902_v0  ;;  %656 = vmatprep.subr.mxu1 %v902_v0  ;;  %v351_v36 = vld [vmem:[#allocation8 + $0x68] sm:$0xff]  ;;  %v350_v37 = vld [vmem:[#allocation8 + $0x60] sm:$0xff]  ;;  %v349_v38 = vld [vmem:[#allocation8 + $0x58] sm:$0xff] }
  0x49   :  { %626 = vmatpush3.msra.mxu0 %v116_v6  ;;  %657 = vmatpush3.msra.mxu1 %v256_v21  ;;  %v348_v39 = vld [vmem:[#allocation8 + $0x50] sm:$0xff]  ;;  %v347_v40 = vld [vmem:[#allocation8 + $0x48] sm:$0xff]  ;;  %v346_v41 = vld [vmem:[#allocation8 + $0x40] sm:$0xff]  ;;  %v231_v6 = vlaneseq }
  0x4a   :  { %627 = vmatprep.subr.mxu0 %v902_v0  ;;  %658 = vmatprep.subr.mxu1 %v902_v0  ;;  %v345_v42 = vld [vmem:[#allocation8 + $0x38] sm:$0xff]  ;;  %v344_v43 = vld [vmem:[#allocation8 + $0x30] sm:$0xff]  ;;  %v343_v44 = vld [vmem:[#allocation8 + $0x28] sm:$0xff] }
  0x4b   :  { %628 = vmatpush3.msra.mxu0 %v115_v7  ;;  %659 = vmatpush3.msra.mxu1 %v255_v22  ;;  %v342_v45 = vld [vmem:[#allocation8 + $0x20] sm:$0xff]  ;;  %v341_v46 = vld [vmem:[#allocation8 + $0x18] sm:$0xff]  ;;  %v232_v7 = vshrl.u32 %v231_v6, 7  ;;  %v340_v19 = vld [vmem:[#allocation8 + $0x10] sm:$0xff] }
  0x4c   :  { %629 = vmatprep.subr.mxu0 %v902_v0  ;;  %660 = vmatprep.subr.mxu1 %v902_v0  ;;  %v543_v47 = vld [vmem:[%s1087_s2] ss:$0 sm:$0xff]  ;;  %v339_v20 = vld [vmem:[#allocation8 + $0x8] sm:$0xff]  ;;  %v338_v21 = vld [vmem:[#allocation8] sm:$0xff] }
  0x4d   :  { %630 = vmatpush3.msra.mxu0 %v114_v8  ;;  %661 = vmatpush3.msra.mxu1 %v254_v23  ;;  %v223_v8 = vld [vmem:[%s1088_s3] sm:$0x1]  ;;  %v446_v23 = vld [vmem:[#allocation10 + $0x70] sm:$0xff] }
  0x4e   :  { %631 = vmatprep.subr.mxu0 %v902_v0  ;;  %662 = vmatprep.subr.mxu1 %v902_v0  ;;  %v447_v22 = vld [vmem:[#allocation10 + $0x78] sm:$0xff] }
  0x4f   :  { %632 = vmatpush3.msra.mxu0 %v113_v9  ;;  %663 = vmatpush3.msra.mxu1 %v253_v24  ;;  %v233_v9 = vsub.s32 0, %v232_v7  ;;  %v445_v24 = vld [vmem:[#allocation10 + $0x68] sm:$0xff] }
  0x50   :  { %633 = vmatprep.subr.mxu0 %v902_v0  ;;  %664 = vmatprep.subr.mxu1 %v902_v0 }
  0x51   :  { %634 = vmatpush3.msra.mxu0 %v112_v10  ;;  %665 = vmatpush3.msra.mxu1 %v252_v25  ;;  %v444_v25 = vld [vmem:[#allocation10 + $0x60] sm:$0xff] }
  0x52   :  { %635 = vmatprep.subr.mxu0 %v902_v0  ;;  %666 = vmatprep.subr.mxu1 %v902_v0 }
  0x53   :  { %636 = vmatpush3.msra.mxu0 %v111_v11  ;;  %667 = vmatpush3.msra.mxu1 %v251_v26  ;;  %v443_v26 = vld [vmem:[#allocation10 + $0x58] sm:$0xff] }
  0x54   :  { %637 = vmatprep.subr.mxu0 %v902_v0  ;;  %668 = vmatprep.subr.mxu1 %v902_v0 }
  0x55   :  { %638 = vmatpush3.msra.mxu0 %v110_v12  ;;  %669 = vmatpush3.msra.mxu1 %v250_v27  ;;  %v227_v12 = vld [vmem:[%s1089_s4] sm:$0x1]  ;;  %v442_v27 = vld [vmem:[#allocation10 + $0x50] sm:$0xff] }
  0x56   :  { %639 = vmatprep.subr.mxu0 %v902_v0  ;;  %670 = vmatprep.subr.mxu1 %v902_v0 }
  0x57   :  { %640 = vmatpush3.msra.mxu0 %v109_v13  ;;  %671 = vmatpush3.msra.mxu1 %v249_v28  ;;  %v441_v28 = vld [vmem:[#allocation10 + $0x48] sm:$0xff] }
  0x58   :  { %641 = vmatprep.subr.mxu0 %v902_v0  ;;  %672 = vmatprep.subr.mxu1 %v902_v0 }
  0x59   :  { %642 = vmatpush3.msra.mxu0 %v108_v14  ;;  %673 = vmatpush3.msra.mxu1 %v248_v29  ;;  %v440_v29 = vld [vmem:[#allocation10 + $0x40] sm:$0xff] }
  0x5a   :  { %643 = vmatprep.subr.mxu0 %v902_v0  ;;  %674 = vmatprep.subr.mxu1 %v902_v0 }
  0x5b   :  { %644 = vmatpush3.msra.mxu0 %v107_v15  ;;  %675 = vmatpush3.msra.mxu1 %v247_v30  ;;  %v439_v30 = vld [vmem:[#allocation10 + $0x38] sm:$0xff] }
  0x5c   :  { %645 = vmatprep.subr.mxu0 %v902_v0  ;;  %676 = vmatprep.subr.mxu1 %v902_v0 }
  0x5d   :  { %646 = vmatpush3.msra.mxu0 %v106_v16  ;;  %677 = vmatpush3.msra.mxu1 %v246_v31  ;;  %v438_v31 = vld [vmem:[#allocation10 + $0x30] sm:$0xff] }
  0x5e   :  { %648 = vmatmul.mubr.f32.vlgmr.msra.gmra.mxu0 %v105_v17  ;;  %685 = vmatprep.subr.mxu0 %v902_v0 }
  0x5f   :  { %717 = vmatprep.mubr.msk.f32.mxu0 %vm903_vm0, %v902_v0  ;;  %678 = vmatprep.subr.mxu1 %v902_v0 }
  0x60   :  { %679 = vmatpush3.msra.mxu1 %v245_v32  ;;  %686 = vmatpush3.msra.mxu0 %v353_v34  ;;  %v437_v32 = vld [vmem:[#allocation10 + $0x28] sm:$0xff]  ;;  %v435_v34 = vld [vmem:[#allocation10 + $0x18] sm:$0xff] }
  0x61   :  { %680 = vmatprep.subr.mxu1 %v902_v0  ;;  %687 = vmatprep.subr.mxu0 %v902_v0 }
  0x62   :  { %681 = vmatpush3.msra.mxu1 %v244_v33  ;;  %688 = vmatpush3.msra.mxu0 %v352_v35  ;;  %v436_v33 = vld [vmem:[#allocation10 + $0x20] sm:$0xff]  ;;  %v544_v35 = vld [vmem:[%s1091_s6] ss:$0 sm:$0xff] }
  0x63   :  { %720 = vmatprep.subr.mxu1 %v902_v0  ;;  %689 = vmatprep.subr.mxu0 %v902_v0 }
  0x64   :  { %690 = vmatpush3.msra.mxu0 %v351_v36 }
  0x65   :  { %691 = vmatprep.subr.mxu0 %v902_v0 }
  0x66   :  { %692 = vmatpush3.msra.mxu0 %v350_v37 }
  0x67   :  { %693 = vmatprep.subr.mxu0 %v902_v0 }
  0x68   :  { %694 = vmatpush3.msra.mxu0 %v349_v38 }
  0x69   :  { %695 = vmatprep.subr.mxu0 %v902_v0 }
  0x6a   :  { %696 = vmatpush3.msra.mxu0 %v348_v39 }
  0x6b   :  { %697 = vmatprep.subr.mxu0 %v902_v0 }
  0x6c   :  { %698 = vmatpush3.msra.mxu0 %v347_v40  ;;  %v434_v40 = vld [vmem:[#allocation10 + $0x10] sm:$0xff] }
  0x6d   :  { %699 = vmatprep.subr.mxu0 %v902_v0 }
  0x6e   :  { %700 = vmatpush3.msra.mxu0 %v346_v41  ;;  %v433_v41 = vld [vmem:[#allocation10 + $0x8] sm:$0xff] }
  0x6f   :  { %701 = vmatprep.subr.mxu0 %v902_v0 }
  0x70   :  { %702 = vmatpush3.msra.mxu0 %v345_v42  ;;  %v432_v42 = vld [vmem:[#allocation10] sm:$0xff] }
  0x71   :  { %703 = vmatprep.subr.mxu0 %v902_v0 }
  0x72   :  { %704 = vmatpush3.msra.mxu0 %v344_v43  ;;  %v545_v43 = vld [vmem:[%s1093_s8] ss:$0 sm:$0xff] }
  0x73   :  { %705 = vmatprep.subr.mxu0 %v902_v0 }
  0x74   :  { %706 = vmatpush3.msra.mxu0 %v343_v44 }
  0x75   :  { %707 = vmatprep.subr.mxu0 %v902_v0 }
  0x76   :  { %708 = vmatpush3.msra.mxu0 %v342_v45 }
  0x77   :  { %709 = vmatprep.subr.mxu0 %v902_v0 }
  0x78   :  { %710 = vmatpush3.msra.mxu0 %v341_v46 }
  0x79   :  { %711 = vmatprep.subr.mxu0 %v902_v0 }
  0x7a   :  { %712 = vmatpush3.msra.mxu0 %v340_v19 }
  0x7b   :  { %713 = vmatprep.subr.mxu0 %v902_v0 }
  0x7c   :  { %714 = vmatpush3.msra.mxu0 %v339_v20 }
  0x7d   :  { %715 = vmatprep.subr.mxu0 %v902_v0 }
  0x7e   :  { %716 = vmatpush3.msra.mxu0 %v338_v21 }
 0x11e   :  { %v195_v48 = vpop.f32.mrf.mxu0 }
 0x11f   :  { %v196_v49 = vadd.f32 %v543_v47, %v195_v48  ;;  %v546_v48 = vld [vmem:[%s1095_s10] ss:$0 sm:$0xff] }
 0x120   :  { %v649_v50 = vpop.f32.mrf.mxu0 }
 0x121   :  { %v199_v51 = vmax.f32 %v196_v49, 0.0 }
 0x123   :  { %v206_v52 = vrot.slane %v199_v51, 4 }
 0x125   :  { %v207_v53 = vadd.f32 %v206_v52, %v199_v51 }
 0x127   :  { %v208_v54 = vrot.slane %v207_v53, 2 }
 0x129   :  { %v209_v55 = vadd.f32 %v208_v54, %v207_v53 }
 0x12b   :  { %v210_v56 = vrot.slane %v209_v55, 1 }
 0x12d   :  { %v211_v57 = vadd.f32 %v210_v56, %v209_v55 }
 0x12f   :  { %v212_v58 = vmul.f32 0.125, %v211_v57 }
 0x131   :  { %v213_v59 = vsub.f32 %v199_v51, %v212_v58 }
 0x133   :  { %v215_v60 = vmul.f32 %v213_v59, %v213_v59 }
 0x135   :  { %v216_v61 = vrot.slane %v215_v60, 4 }
 0x137   :  { %v217_v62 = vadd.f32 %v216_v61, %v215_v60 }
 0x139   :  { %v218_v63 = vrot.slane %v217_v62, 2 }
 0x13b   :  { %v219_v1 = vadd.f32 %v218_v63, %v217_v62 }
 0x13d   :  { %v220_v2 = vrot.slane %v219_v1, 1 }
 0x13f   :  { %v221_v3 = vadd.f32 %v220_v2, %v219_v1 }
 0x141   :  { %v222_v4 = vmul.f32 0.125, %v221_v3 }
 0x143   :  { %v224_v5 = vadd.f32 1e-05, %v222_v4 }
 0x145   :  { %765 = vrsqrt.f32 %v224_v5 }
 0x152   :  { %v766_v10 = vpop.eup %765 }
 0x153   :  { %v226_v11 = vmul.f32 %v766_v10, %v223_v8 }
 0x155   :  { %v228_v13 = vmul.f32 %v226_v11, %v212_v58  ;;  %v234_v14 = vrot.slane %v226_v11, %v233_v9 }
 0x157   :  { %v229_v15 = vsub.f32 %v227_v12, %v228_v13  ;;  %v236_v16 = vmul.f32 %v234_v14, %v199_v51 }
 0x159   :  { %v241_v17 = vrot.slane %v229_v15, %v233_v9 }
 0x15b   :  { %v243_v18 = vadd.f32 %v241_v17, %v236_v16 }
 0x15d   :  { %683 = vmatmul.mubr.f32.vlgmr.msra.gmra.mxu1 %v243_v18 }
 0x15e   :  { %752 = vmatprep.mubr.msk.f32.mxu1 %vm903_vm0, %v902_v0  ;;  %721 = vmatpush3.msra.mxu1 %v447_v22 }
 0x15f   :  { %722 = vmatprep.subr.mxu1 %v902_v0 }
 0x160   :  { %723 = vmatpush3.msra.mxu1 %v446_v23 }
 0x161   :  { %724 = vmatprep.subr.mxu1 %v902_v0 }
 0x162   :  { %725 = vmatpush3.msra.mxu1 %v445_v24 }
 0x163   :  { %726 = vmatprep.subr.mxu1 %v902_v0 }
 0x164   :  { %727 = vmatpush3.msra.mxu1 %v444_v25 }
 0x165   :  { %728 = vmatprep.subr.mxu1 %v902_v0 }
 0x166   :  { %729 = vmatpush3.msra.mxu1 %v443_v26 }
 0x167   :  { %730 = vmatprep.subr.mxu1 %v902_v0 }
 0x168   :  { %731 = vmatpush3.msra.mxu1 %v442_v27 }
 0x169   :  { %732 = vmatprep.subr.mxu1 %v902_v0 }
 0x16a   :  { %733 = vmatpush3.msra.mxu1 %v441_v28 }
 0x16b   :  { %734 = vmatprep.subr.mxu1 %v902_v0 }
 0x16c   :  { %735 = vmatpush3.msra.mxu1 %v440_v29 }
 0x16d   :  { %736 = vmatprep.subr.mxu1 %v902_v0 }
 0x16e   :  { %737 = vmatpush3.msra.mxu1 %v439_v30 }
 0x16f   :  { %738 = vmatprep.subr.mxu1 %v902_v0 }
 0x170   :  { %739 = vmatpush3.msra.mxu1 %v438_v31 }
 0x171   :  { %740 = vmatprep.subr.mxu1 %v902_v0 }
 0x172   :  { %741 = vmatpush3.msra.mxu1 %v437_v32 }
 0x173   :  { %742 = vmatprep.subr.mxu1 %v902_v0 }
 0x174   :  { %743 = vmatpush3.msra.mxu1 %v436_v33 }
 0x175   :  { %744 = vmatprep.subr.mxu1 %v902_v0 }
 0x176   :  { %745 = vmatpush3.msra.mxu1 %v435_v34 }
 0x177   :  { %746 = vmatprep.subr.mxu1 %v902_v0 }
 0x178   :  { %747 = vmatpush3.msra.mxu1 %v434_v40 }
 0x179   :  { %748 = vmatprep.subr.mxu1 %v902_v0 }
 0x17a   :  { %749 = vmatpush3.msra.mxu1 %v433_v41 }
 0x17b   :  { %750 = vmatprep.subr.mxu1 %v902_v0 }
 0x17c   :  { %751 = vmatpush3.msra.mxu1 %v432_v42 }
 0x21d   :  { %v333_v36 = vpop.f32.mrf.mxu1 }
 0x21e   :  { %v334_v37 = vadd.f32 %v544_v35, %v333_v36 }
 0x21f   :  { %v684_v38 = vpop.f32.mrf.mxu1 }
 0x220   :  { %v337_v39 = vmax.f32 %v334_v37, 0.0 }
 0x222   :  { %718 = vmatmul.mubr.f32.vlgmr.msra.gmra.mxu0 %v337_v39 }
 0x2e2   :  { %v427_v44 = vpop.f32.mrf.mxu0 }
 0x2e3   :  { %v428_v45 = vadd.f32 %v545_v43, %v427_v44 }
 0x2e4   :  { %v719_v46 = vpop.f32.mrf.mxu0 }
 0x2e5   :  { %v431_v47 = vmax.f32 %v428_v45, 0.0 }
 0x2e7   :  { %753 = vmatmul.mubr.f32.vlgmr.msra.gmra.mxu1 %v431_v47 }
 0x3a7   :  { %v521_v49 = vpop.f32.mrf.mxu1 }
 0x3a8   :  { %v522_v50 = vadd.f32 %v546_v48, %v521_v49 }
 0x3a9   :  { %v754_v0 = vpop.f32.mrf.mxu1 }
 0x3aa   :  { %525 = vst [vmem:[#allocation11] sm:$0xff] %v522_v50 }
 0x3ab   :  { %878 = shalt.err (!%p875_p1)
}
 0x3ac   :  { %535 = dma.vmem_to_hbm [thread:$0]  %s533_s29, 128, %s1096_s11, [#allocation4]  }
 0x3ad   :  { %893 = dma.done.wait [#allocation4], 128  }
 0x3ae   :  { %894 = vsyncadd [#allocation4], 4294967168 }
 0x3af   :  { %539 = vsyncpa [#allocation3], 1 }
 0x3b0   :  { %540 = vsyncpa [#allocation6], 1 }
 0x3b1   :  { %541 = vsyncpa [#allocation9], 1 }
 0x3b2   :  { %542 = vsyncpa [#allocation4], 1 }

</bundles_post_ra>
